<compile_context>
chip_gen: v5e
topology: v5e:2x2
jax: 0.10.0
libtpu: 0.0.40
codegen_flags: <defaults>
</compile_context>

<pallas_src>
import functools

import jax
import jax.numpy as jnp
from jax import lax
from jax.experimental import pallas as pl
from jax.experimental.pallas import tpu as pltpu

_VMEM = pltpu.MemorySpace.VMEM


def prepare_params(weight, bias, compute_dtype=jnp.float32):
    """One-time (init-time) parameter prep. Keeps the per-call path copy-free.

    weight: (C, F), bias: (C,).  Returns (weight_c, bias_2d) where weight_c is
    cast to the MXU compute dtype and bias_2d is a (1, C) f32 row (f32 bias add
    after the f32 accumulate).
    """
    w_c = weight.astype(compute_dtype)
    b2d = bias.astype(jnp.float32).reshape(1, -1)
    return w_c, b2d


def meta_linear_kernel(x_ref, w_ref, b_ref, o_ref):
    # x_ref: (tb, F)   w_ref: (tc, F)   b_ref: (1, tc)   o_ref: (tb, tc)
    # out = x @ W.T + b, expressed as a dot_general contracting dim 1 of both
    # operands so no transpose of W is materialized before the MXU push.
    acc = lax.dot_general(
        x_ref[...],
        w_ref[...],
        dimension_numbers=(((1,), (1,)), ((), ())),
        preferred_element_type=jnp.float32,
    )
    o_ref[...] = (acc + b_ref[...]).astype(o_ref.dtype)


@functools.partial(jax.jit, static_argnames=("max_tb", "max_tc"))
def meta_model_forward(x, weight_c, bias_2d, *, max_tb=256, max_tc=512):
    """x: (B, window_len, num_channels); weight_c: (C, F); bias_2d: (1, C).

    Returns f32 (B, C) == F.linear(x.view(B, F), W, b).
    """
    B = x.shape[0]
    C, F = weight_c.shape
    x_flat = x.reshape(B, F).astype(weight_c.dtype)  # torch .view equivalent

    out_shape = jax.ShapeDtypeStruct((B, C), jnp.float32)

    if B <= max_tb and C <= max_tc:
        # Single-shot: everything resident in VMEM, no grid / pipeline
        # bookkeeping.  Full-array blocks, unpadded in and out.
        return pl.pallas_call(
            meta_linear_kernel,
            out_shape=out_shape,
            in_specs=[
                pl.BlockSpec(memory_space=_VMEM),  # x   (B, F)
                pl.BlockSpec(memory_space=_VMEM),  # W   (C, F)
                pl.BlockSpec(memory_space=_VMEM),  # b   (1, C)
            ],
            out_specs=pl.BlockSpec(memory_space=_VMEM),
        )(x_flat, weight_c, bias_2d)

    # Large-shape path: tile batch and classes.  Tiles are (8,128)-legal
    # (tb mult of 8 or == B, tc mult of 128 or == C); boundary blocks are
    # masked by Mosaic.  "parallel" on both axes lets v7x's two TensorCores
    # split the grid; BlockSpec double-buffering overlaps the W-tile DMA with
    # the MXU.
    tb = B if B <= max_tb else max_tb
    tc = C if C <= max_tc else max_tc
    grid = (pl.cdiv(B, tb), pl.cdiv(C, tc))
    return pl.pallas_call(
        meta_linear_kernel,
        out_shape=out_shape,
        grid=grid,
        in_specs=[
            pl.BlockSpec((tb, F), lambda i, j: (i, 0), memory_space=_VMEM),
            pl.BlockSpec((tc, F), lambda i, j: (j, 0), memory_space=_VMEM),
            pl.BlockSpec((1, tc), lambda i, j: (0, j), memory_space=_VMEM),
        ],
        out_specs=pl.BlockSpec((tb, tc), lambda i, j: (i, j), memory_space=_VMEM),
        compiler_params=pltpu.CompilerParams(
            dimension_semantics=("parallel", "parallel"),
        ),
    )(x_flat, weight_c, bias_2d)


if __name__ == "__main__":
    # Small shapes implied by the module: batch=2, window_len=16, num_channels=4,
    # num_classes=8  ->  in_features = 64.
    batch, window_len, num_channels, num_classes = 2, 16, 4, 8
    in_features = window_len * num_channels

    key = jax.random.PRNGKey(0)
    kx, kw, kb = jax.random.split(key, 3)

    x = jax.random.normal(kx, (batch, window_len, num_channels), dtype=jnp.float32)
    # Deterministic parameter init (nn.Linear-style uniform bound 1/sqrt(fan_in)).
    bound = 1.0 / jnp.sqrt(jnp.float32(in_features))
    weight = jax.random.uniform(
        kw, (num_classes, in_features), minval=-bound, maxval=bound, dtype=jnp.float32
    )
    bias = jax.random.uniform(
        kb, (num_classes,), minval=-bound, maxval=bound, dtype=jnp.float32
    )

    # Parameter prep hoisted out of the per-call path (done once at init).
    # fp32 compute dtype here keeps the exactness check vs the fp32 reference;
    # pass compute_dtype=jnp.bfloat16 for large HBM-bound shapes.
    weight_c, bias_2d = prepare_params(weight, bias, compute_dtype=jnp.float32)

    out = meta_model_forward(x, weight_c, bias_2d)
    out = jax.block_until_ready(out)

    # Sanity check against plain-JAX reference (fp32 F.linear semantics).
    ref = x.reshape(batch, in_features) @ weight.T + bias
    assert out.shape == (batch, num_classes)
    assert jnp.allclose(out, ref, atol=1e-5, rtol=1e-5)

    print("KERNEL_OK")
</pallas_src>

<mosaic_0001>
module attributes {stable_mosaic.version = 11 : i64} {
  func.func @meta_linear_kernel(%arg0: memref<2x64xf32, #tpu.memory_space<vmem>>, %arg1: memref<8x64xf32, #tpu.memory_space<vmem>>, %arg2: memref<1x8xf32, #tpu.memory_space<vmem>>, %arg3: memref<2x8xf32, #tpu.memory_space<vmem>>) attributes {dimension_semantics = [], scalar_prefetch = 0 : i64, scratch_operands = 0 : i64, tpu.core_type = #tpu.core_type<tc>} {
    %c0 = arith.constant 0 : index
    %c0_0 = arith.constant 0 : index
    %0 = vector.load %arg0[%c0, %c0_0] : memref<2x64xf32, #tpu.memory_space<vmem>>, vector<2x64xf32>
    %c0_1 = arith.constant 0 : index
    %c0_2 = arith.constant 0 : index
    %1 = vector.load %arg1[%c0_1, %c0_2] : memref<8x64xf32, #tpu.memory_space<vmem>>, vector<8x64xf32>
    %cst = arith.constant dense<0.000000e+00> : vector<2x8xf32>
    %2 = tpu.matmul %0, %1, %cst {dimension_numbers = #tpu.dot_dimension_numbers<[1], [1], [0], [0], [0, 0, 1, 0], [], []>} : vector<2x64xf32>, vector<8x64xf32>, vector<2x8xf32> -> vector<2x8xf32>
    %c0_3 = arith.constant 0 : index
    %c0_4 = arith.constant 0 : index
    %3 = vector.load %arg2[%c0_3, %c0_4] : memref<1x8xf32, #tpu.memory_space<vmem>>, vector<1x8xf32>
    %4 = vector.broadcast %3 : vector<1x8xf32> to vector<2x8xf32>
    %5 = arith.addf %2, %4 : vector<2x8xf32>
    %c0_5 = arith.constant 0 : index
    %c0_6 = arith.constant 0 : index
    %6 = vector.load %arg3[%c0_5, %c0_6] : memref<2x8xf32, #tpu.memory_space<vmem>>, vector<2x8xf32>
    tpu.vector_store %arg3[%c0_5, %c0_6], %5 {strides = array<i32>} : memref<2x8xf32, #tpu.memory_space<vmem>>, vector<2x8xf32>,
    return
  }
}

</mosaic_0001>

<bundles_post_ra>
// kernel: meta_model_forward.1
= control target key start
LH: loop header
LB: loop body
LE: loop exit
PB: predicated region body
PF: predicated region fallthrough
CT: control target
= control target key end

     0   :  { %vm21_vm0 = vcmask 523264   ;;  %s129_s0 = inlined_call_operand.vmem [shape: f32[2,64], index: 0, kind: input, shape index: {}]   ;;  %s130_s1 = inlined_call_operand.vmem [shape: f32[8,64], index: 1, kind: input, shape index: {}]   ;;  %s131_s2 = inlined_call_operand.vmem [shape: f32[1,8], index: 2, kind: input, shape index: {}]   ;;  %s132_s3 = inlined_call_operand.hbm [shape: f32[2,8], index: 3, kind: output, shape index: {}]  }
   0x1   :  { %v16_v0 = vld [vmem:[%s130_s1] sm:$0xff] }
   0x2   :  { %66 = vmatpush.xpose.msk.msra.mxu0 %vm21_vm0, %v16_v0  ;;  %v15_v1 = vld [vmem:[%s129_s0] sm:$0x3] }
   0x3   :  { %8 = vsyncpa [#allocation3], 0  ;;  %v69_v2 = vld [vmem:[%s131_s2] ss:$0 sm:$0xff]  ;;  %s96_s18 = smov [#allocation2]   ;;  %s57_s22 = sshll.u32 %s132_s3, 4  ;;  %s58_s22 = int_to_ptr.hbm [resolvable:$true] %s57_s22 }
   0x4   :  { %s55_s19 = sshll.u32 %s96_s18, 4  ;;  %vm48_vm1 = vcmask 58368   ;;  %s56_s19 = int_to_ptr.vmem [resolvable:$true] %s55_s19 }
   0x5   :  { %67 = vmatmul.msk.f32.vlgmr.msra.gmra.mxu0 %vm21_vm0, %v15_v1 }
  0x82   :  { %v45_v3 = vpop.f32.mrf.mxu0 }
  0x83   :  { %v46_v4 = vadd.f32 %v69_v2, %v45_v3 }
  0x85   :  { %49 = vst.msk [vmem:[#allocation2] sm:$0x3] %vm48_vm1, %v46_v4 }
  0x86   :  { %60 = dma.vmem_to_hbm [thread:$0]  %s56_s19, 32, %s58_s22, [#allocation3]  }
  0x87   :  { %94 = dma.done.wait [#allocation3], 32  }
  0x88   :  { %95 = vsyncadd [#allocation3], 4294967264 }
  0x89   :  { %65 = vsyncpa [#allocation3], 1 }

</bundles_post_ra>
